<compile_context>
chip_gen: v7x
topology: tpu7x:2x2x1
jax: 0.10.0
libtpu: 0.0.40
codegen_flags: <defaults>
</compile_context>

<pallas_src>
import jax
import jax.numpy as jnp
from jax.experimental import pallas as pl
from jax.experimental.pallas import tpu as pltpu


# ----------------------------------------------------------------------------
# Tiling helpers
# ----------------------------------------------------------------------------

def _round_up(x, m):
    return (x + m - 1) // m * m


def _plan_m(m):
    """(tile, padded) for the M (row) dimension; tile is a multiple of 8."""
    if m < 128:
        mp = _round_up(m, 8)
        return mp, mp
    for t in (512, 256, 128):
        if m % t == 0:
            return t, m
    return 128, _round_up(m, 128)


def _plan_k(k):
    """(tile, padded) for the contraction dimension; tile multiple of 128."""
    for t in (512, 256, 128):
        if k % t == 0:
            return t, k
    kp = _round_up(k, 128)
    for t in (512, 256, 128):
        if kp % t == 0:
            return t, kp
    return 128, kp


def _plan_n(n):
    """(tile, padded) for the N (output-channel) dimension; multiple of 128."""
    for t in (512, 256, 128):
        if n % t == 0:
            return t, n
    np_ = _round_up(n, 128)
    for t in (512, 256, 128):
        if np_ % t == 0:
            return t, np_
    return 128, np_


# ----------------------------------------------------------------------------
# Pallas kernels
# ----------------------------------------------------------------------------

def _make_mm_bn_kernel(apply_relu: bool, has_residual: bool):
    """Tiled bf16 matmul, f32 accumulation, fused BN affine epilogue,
    optional residual add and optional ReLU."""

    def kernel(a_ref, b_ref, scale_ref, shift_ref, *rest):
        if has_residual:
            res_ref, o_ref, acc_ref = rest
        else:
            res_ref = None
            o_ref, acc_ref = rest

        k = pl.program_id(2)

        @pl.when(k == 0)
        def _():
            acc_ref[...] = jnp.zeros_like(acc_ref)

        acc_ref[...] += jnp.dot(
            a_ref[...], b_ref[...], preferred_element_type=jnp.float32
        )

        @pl.when(k == pl.num_programs(2) - 1)
        def _():
            y = acc_ref[...] * scale_ref[...] + shift_ref[...]
            if has_residual:
                y = y + res_ref[...].astype(jnp.float32)
            if apply_relu:
                y = jnp.maximum(y, 0.0)
            o_ref[...] = y.astype(o_ref.dtype)

    return kernel


_MM_KERNELS = {
    (relu, res): _make_mm_bn_kernel(relu, res)
    for relu in (False, True)
    for res in (False, True)
}


def _global_avgpool_kernel(x_ref, o_ref):
    # x: (B, HW, TC) -> o: (B, TC), mean over spatial positions (f32 accumulate)
    o_ref[...] = jnp.mean(x_ref[...].astype(jnp.float32), axis=1)


# ----------------------------------------------------------------------------
# Pallas wrappers
# ----------------------------------------------------------------------------

def matmul_bn_act(a, prep, *, relu, residual=None, out_dtype=jnp.bfloat16):
    """out = act((a @ W) * scale + shift [+ residual]).

    `a` : (M, K) activations (any float dtype; cast to bf16).
    `prep`: dict from prep_matmul_weights (padded bf16 weight, f32 scale/shift).
    """
    M, K = a.shape
    assert K == prep["K"], (K, prep["K"])
    w_p, sc_p, sh_p = prep["w"], prep["scale"], prep["shift"]
    Kp, Np = w_p.shape
    TK, TN, N = prep["TK"], prep["TN"], prep["N"]
    TM, Mp = _plan_m(M)

    a = a.astype(jnp.bfloat16)
    if (Mp, Kp) != (M, K):
        a = jnp.pad(a, ((0, Mp - M), (0, Kp - K)))

    inputs = [a, w_p, sc_p, sh_p]
    in_specs = [
        pl.BlockSpec((TM, TK), lambda i, j, k: (i, k)),
        pl.BlockSpec((TK, TN), lambda i, j, k: (k, j)),
        pl.BlockSpec((1, TN), lambda i, j, k: (0, j)),
        pl.BlockSpec((1, TN), lambda i, j, k: (0, j)),
    ]

    has_res = residual is not None
    if has_res:
        r = residual.astype(jnp.bfloat16)
        if r.shape != (Mp, Np):
            r = jnp.pad(r, ((0, Mp - M), (0, Np - N)))
        inputs.append(r)
        in_specs.append(pl.BlockSpec((TM, TN), lambda i, j, k: (i, j)))

    kernel = _MM_KERNELS[(relu, has_res)]

    flops = 2 * Mp * Np * Kp
    bytes_accessed = (
        Mp * Kp * 2 + Kp * Np * 2 + Mp * Np * 2 * (2 if has_res else 1)
        + 2 * Np * 4
    )

    out = pl.pallas_call(
        kernel,
        out_shape=jax.ShapeDtypeStruct((Mp, Np), out_dtype),
        grid_spec=pltpu.PrefetchScalarGridSpec(
            num_scalar_prefetch=0,
            grid=(Mp // TM, Np // TN, Kp // TK),
            in_specs=in_specs,
            out_specs=pl.BlockSpec((TM, TN), lambda i, j, k: (i, j)),
            scratch_shapes=[pltpu.VMEM((TM, TN), jnp.float32)],
        ),
        compiler_params=pltpu.CompilerParams(
            dimension_semantics=("parallel", "parallel", "arbitrary"),
            vmem_limit_bytes=32 * 1024 * 1024,
        ),
        cost_estimate=pl.CostEstimate(
            flops=flops, transcendentals=0, bytes_accessed=bytes_accessed
        ),
    )(*inputs)

    if (Mp, Np) != (M, N):
        out = out[:M, :N]
    return out


def global_avg_pool(x):
    """(B, H, W, C) -> (B, C) mean over spatial dims (AdaptiveAvgPool2d(1))."""
    B, H, W, C = x.shape
    HW = H * W
    x2 = x.reshape(B, HW, C)
    if C % 512 == 0:
        TC = 512
    elif C % 256 == 0:
        TC = 256
    elif C % 128 == 0:
        TC = 128
    else:
        TC = C
    return pl.pallas_call(
        _global_avgpool_kernel,
        out_shape=jax.ShapeDtypeStruct((B, C), jnp.float32),
        grid_spec=pltpu.PrefetchScalarGridSpec(
            num_scalar_prefetch=0,
            grid=(C // TC,),
            in_specs=[pl.BlockSpec((B, HW, TC), lambda c: (0, 0, c))],
            out_specs=pl.BlockSpec((B, TC), lambda c: (0, c)),
        ),
        compiler_params=pltpu.CompilerParams(
            dimension_semantics=("parallel",),
            vmem_limit_bytes=32 * 1024 * 1024,
        ),
    )(x2)


# ----------------------------------------------------------------------------
# Conv / BN glue (im2col in bf16 + fused Pallas matmul)
# ----------------------------------------------------------------------------

def _fold_bn(bn, eps=1e-5):
    scale = bn["gamma"] / jnp.sqrt(bn["var"] + eps)
    shift = bn["beta"] - bn["mean"] * scale
    return scale, shift


def _im2col(x, kh, kw, stride, pad):
    """x: (B,H,W,C) NHWC -> patches (B,Ho,Wo, kh*kw*C) in (kh,kw,c) order."""
    B, H, W, C = x.shape
    if pad:
        x = jnp.pad(x, ((0, 0), (pad, pad), (pad, pad), (0, 0)))
    Ho = (H + 2 * pad - kh) // stride + 1
    Wo = (W + 2 * pad - kw) // stride + 1
    cols = []
    for i in range(kh):
        for j in range(kw):
            cols.append(
                x[:, i : i + stride * (Ho - 1) + 1 : stride,
                     j : j + stride * (Wo - 1) + 1 : stride, :]
            )
    return jnp.concatenate(cols, axis=-1), Ho, Wo


def prep_matmul_weights(wm, scale, shift):
    """Fold/pad/cast a (K, N) weight + per-channel affine once, outside forward."""
    K, N = wm.shape
    TK, Kp = _plan_k(K)
    TN, Np = _plan_n(N)
    w_p = jnp.pad(wm.astype(jnp.bfloat16), ((0, Kp - K), (0, Np - N)))
    sc_p = jnp.pad(scale.astype(jnp.float32), (0, Np - N)).reshape(1, Np)
    sh_p = jnp.pad(shift.astype(jnp.float32), (0, Np - N)).reshape(1, Np)
    return dict(w=w_p, scale=sc_p, shift=sh_p, K=K, N=N, TK=TK, TN=TN)


def prep_conv(w_oihw, bn, eps=1e-5):
    O, Cin, KH, KW = w_oihw.shape
    scale, shift = _fold_bn(bn, eps)
    wm = jnp.transpose(w_oihw, (2, 3, 1, 0)).reshape(KH * KW * Cin, O)
    p = prep_matmul_weights(wm, scale, shift)
    p.update(KH=KH, KW=KW, Cin=Cin, O=O)
    return p


def conv_bn(x, cp, stride, pad, relu, residual=None):
    """Conv2d (no bias) + folded BN + optional ReLU (+ optional fused residual).

    x: (B,H,W,Cin) NHWC bf16.  Returns (B,Ho,Wo,O) bf16.
    """
    B = x.shape[0]
    KH, KW = cp["KH"], cp["KW"]
    if KH == 1 and KW == 1:
        if stride > 1:
            x = x[:, ::stride, ::stride, :]
        Ho, Wo = x.shape[1], x.shape[2]
        a = x.reshape(B * Ho * Wo, cp["Cin"])
    else:
        patches, Ho, Wo = _im2col(x, KH, KW, stride, pad)
        a = patches.reshape(B * Ho * Wo, KH * KW * cp["Cin"])

    res2 = None
    if residual is not None:
        res2 = residual.reshape(B * Ho * Wo, cp["O"])

    y = matmul_bn_act(a, cp, relu=relu, residual=res2)
    return y.reshape(B, Ho, Wo, cp["O"])


# ----------------------------------------------------------------------------
# Parameters (deterministic synthetic init; shapes match the PyTorch module)
# ----------------------------------------------------------------------------

class KeyGen:
    def __init__(self, key):
        self._key = key

    def __call__(self):
        self._key, sub = jax.random.split(self._key)
        return sub


def _conv_w(key, o, i, kh, kw):
    return jax.random.normal(key, (o, i, kh, kw), jnp.float32) * 0.05


def _bn_params(c):
    return dict(
        gamma=jnp.ones((c,), jnp.float32),
        beta=jnp.zeros((c,), jnp.float32),
        mean=jnp.zeros((c,), jnp.float32),
        var=jnp.ones((c,), jnp.float32),
    )


# ResNet-50 layer config: (planes, num_blocks, stride_of_first_block)
_RESNET50_CFG = [(64, 3, 1), (128, 4, 2), (256, 6, 2), (512, 3, 2)]
_EXPANSION = 4


def make_params(kg):
    p = {}
    # Modified conv1: Conv2d(3, 64, kernel_size=3, stride=1, padding=0, bias=False)
    p["conv1_w"] = _conv_w(kg(), 64, 3, 3, 3)
    p["bn1"] = _bn_params(64)

    inplanes = 64
    layers = []
    for planes, blocks, stride in _RESNET50_CFG:
        block_params = []
        for b in range(blocks):
            s = stride if b == 0 else 1
            bp = {
                "conv1_w": _conv_w(kg(), planes, inplanes, 1, 1),
                "bn1": _bn_params(planes),
                "conv2_w": _conv_w(kg(), planes, planes, 3, 3),
                "bn2": _bn_params(planes),
                "conv3_w": _conv_w(kg(), planes * _EXPANSION, planes, 1, 1),
                "bn3": _bn_params(planes * _EXPANSION),
            }
            if s != 1 or inplanes != planes * _EXPANSION:
                bp["down_w"] = _conv_w(kg(), planes * _EXPANSION, inplanes, 1, 1)
                bp["down_bn"] = _bn_params(planes * _EXPANSION)
            block_params.append(bp)
            inplanes = planes * _EXPANSION
        layers.append(block_params)
    p["layers"] = layers

    # ProjectionHead('nonlinear'): Linear(2048->2048, no bias) + BN1d + ReLU
    #                              + Linear(2048->128, no bias) + BN1d
    p["proj"] = dict(
        lin1_w=jax.random.normal(kg(), (2048, 2048), jnp.float32) * 0.02,  # torch (out,in)
        bn1=_bn_params(2048),
        lin2_w=jax.random.normal(kg(), (128, 2048), jnp.float32) * 0.02,
        bn2=_bn_params(128),
    )
    return p


def prepare_model(raw):
    """One-time weight prep: fold BN, transpose OIHW->(K,N), pad, cast to bf16."""
    mp = {"stem": prep_conv(raw["conv1_w"], raw["bn1"])}
    layers = []
    for block_list in raw["layers"]:
        blocks = []
        for bp in block_list:
            b = {
                "conv1": prep_conv(bp["conv1_w"], bp["bn1"]),
                "conv2": prep_conv(bp["conv2_w"], bp["bn2"]),
                "conv3": prep_conv(bp["conv3_w"], bp["bn3"]),
            }
            if "down_w" in bp:
                b["down"] = prep_conv(bp["down_w"], bp["down_bn"])
            blocks.append(b)
        layers.append(blocks)
    mp["layers"] = layers

    pj = raw["proj"]
    s1, t1 = _fold_bn(pj["bn1"])
    mp["proj1"] = prep_matmul_weights(pj["lin1_w"].T, s1, t1)
    s2, t2 = _fold_bn(pj["bn2"])
    mp["proj2"] = prep_matmul_weights(pj["lin2_w"].T, s2, t2)
    return mp


# ----------------------------------------------------------------------------
# Forward pass
# ----------------------------------------------------------------------------

def bottleneck(x, bp, stride):
    if "down" in bp:
        identity = conv_bn(x, bp["down"], stride=stride, pad=0, relu=False)
    else:
        identity = x
    out = conv_bn(x, bp["conv1"], stride=1, pad=0, relu=True)
    out = conv_bn(out, bp["conv2"], stride=stride, pad=1, relu=True)
    # conv3 + BN + residual add + ReLU fused into one kernel epilogue
    out = conv_bn(out, bp["conv3"], stride=1, pad=0, relu=True, residual=identity)
    return out


def pretrained_model_forward(x_nchw, mp):
    # layout: input NCHW (PyTorch) -> NHWC bf16 for the TPU kernels.
    x = jnp.transpose(x_nchw, (0, 2, 3, 1)).astype(jnp.bfloat16)

    # stem: conv1 -> bn1 -> relu ; maxpool replaced by Identity
    x = conv_bn(x, mp["stem"], stride=1, pad=0, relu=True)

    # layer1..layer4 (Bottleneck blocks)
    for (planes, blocks, stride), block_list in zip(_RESNET50_CFG, mp["layers"]):
        for bidx, bp in enumerate(block_list):
            s = stride if bidx == 0 else 1
            x = bottleneck(x, bp, s)

    # AdaptiveAvgPool2d(1) + flatten ; fc replaced by Identity
    feat = global_avg_pool(x)          # (B, 2048) f32
    feat = jnp.squeeze(feat)           # mirrors torch.squeeze(out); no-op for B > 1

    # projector (nonlinear head): both Linear layers have no bias (use_bn=True)
    h = matmul_bn_act(feat, mp["proj1"], relu=True)
    z = matmul_bn_act(h, mp["proj2"], relu=False, out_dtype=jnp.float32)
    return z


# ----------------------------------------------------------------------------
# Main
# ----------------------------------------------------------------------------

if __name__ == "__main__":
    root = jax.random.PRNGKey(0)
    k_x, k_params = jax.random.split(root)

    # small input consistent with the module: NCHW, 3 channels
    x = jax.random.normal(k_x, (2, 3, 16, 16), jnp.float32)

    raw_params = make_params(KeyGen(k_params))
    model = prepare_model(raw_params)     # one-time weight folding / padding

    out = pretrained_model_forward(x, model)
    out = jax.block_until_ready(out)

    assert out.shape == (2, 128), out.shape
    assert bool(jnp.all(jnp.isfinite(out)))
    print("KERNEL_OK")
</pallas_src>

<mosaic_0001>
module attributes {stable_mosaic.version = 11 : i64} {
  func.func @kernel(%arg0: i32, %arg1: i32, %arg2: i32, %arg3: memref<128x128xbf16, #tpu.memory_space<vmem>>, %arg4: memref<128x128xbf16, #tpu.memory_space<vmem>>, %arg5: memref<1x128xf32, #tpu.memory_space<vmem>>, %arg6: memref<1x128xf32, #tpu.memory_space<vmem>>, %arg7: memref<128x128xbf16, #tpu.memory_space<vmem>>, %arg8: memref<128x128xf32, #tpu.memory_space<vmem>>) attributes {dimension_semantics = [#tpu.dimension_semantics<parallel>, #tpu.dimension_semantics<parallel>, #tpu.dimension_semantics<arbitrary>], iteration_bounds = array<i64: 4, 1, 1>, scalar_prefetch = 0 : i64, scratch_operands = 1 : i64, tpu.core_type = #tpu.core_type<tc>, window_params = [{transform_indices = @transform_0, window_bounds = array<i64: 128, 128>}, {transform_indices = @transform_1, window_bounds = array<i64: 128, 128>}, {transform_indices = @transform_2, window_bounds = array<i64: 1, 128>}, {transform_indices = @transform_3, window_bounds = array<i64: 1, 128>}, {transform_indices = @transform_4, window_bounds = array<i64: 128, 128>}]} {
    %c0_i32 = arith.constant 0 : i32
    %0 = arith.cmpi eq, %arg2, %c0_i32 : i32
    %1 = arith.extui %0 : i1 to i32
    %c0_i32_0 = arith.constant 0 : i32
    %2 = arith.cmpi ne, %1, %c0_i32_0 : i32
    scf.if %2 {
      %cst_10 = arith.constant 0.000000e+00 : f32
      %12 = vector.broadcast %cst_10 : f32 to vector<128x128xf32>
      %c0_11 = arith.constant 0 : index
      %c0_12 = arith.constant 0 : index
      %13 = vector.load %arg8[%c0_11, %c0_12] : memref<128x128xf32, #tpu.memory_space<vmem>>, vector<128x128xf32>
      tpu.vector_store %arg8[%c0_11, %c0_12], %12 {strides = array<i32>} : memref<128x128xf32, #tpu.memory_space<vmem>>, vector<128x128xf32>,
    } else {
    }
    %c0 = arith.constant 0 : index
    %c0_1 = arith.constant 0 : index
    %3 = vector.load %arg8[%c0, %c0_1] : memref<128x128xf32, #tpu.memory_space<vmem>>, vector<128x128xf32>
    %c0_2 = arith.constant 0 : index
    %c0_3 = arith.constant 0 : index
    %4 = vector.load %arg3[%c0_2, %c0_3] : memref<128x128xbf16, #tpu.memory_space<vmem>>, vector<128x128xbf16>
    %c0_4 = arith.constant 0 : index
    %c0_5 = arith.constant 0 : index
    %5 = vector.load %arg4[%c0_4, %c0_5] : memref<128x128xbf16, #tpu.memory_space<vmem>>, vector<128x128xbf16>
    %cst = arith.constant dense<0.000000e+00> : vector<128x128xf32>
    %6 = tpu.matmul %4, %5, %cst {dimension_numbers = #tpu.dot_dimension_numbers<[1], [0], [0], [1], [0, 0, 1, 1], [], []>} : vector<128x128xbf16>, vector<128x128xbf16>, vector<128x128xf32> -> vector<128x128xf32>
    %7 = arith.addf %3, %6 : vector<128x128xf32>
    %c0_6 = arith.constant 0 : index
    %c0_7 = arith.constant 0 : index
    %8 = vector.load %arg8[%c0_6, %c0_7] : memref<128x128xf32, #tpu.memory_space<vmem>>, vector<128x128xf32>
    tpu.vector_store %arg8[%c0_6, %c0_7], %7 {strides = array<i32>} : memref<128x128xf32, #tpu.memory_space<vmem>>, vector<128x128xf32>,
    %c0_i32_8 = arith.constant 0 : i32
    %9 = arith.cmpi eq, %arg2, %c0_i32_8 : i32
    %10 = arith.extui %9 : i1 to i32
    %c0_i32_9 = arith.constant 0 : i32
    %11 = arith.cmpi ne, %10, %c0_i32_9 : i32
    scf.if %11 {
      %c0_10 = arith.constant 0 : index
      %c0_11 = arith.constant 0 : index
      %12 = vector.load %arg8[%c0_10, %c0_11] : memref<128x128xf32, #tpu.memory_space<vmem>>, vector<128x128xf32>
      %c0_12 = arith.constant 0 : index
      %c0_13 = arith.constant 0 : index
      %13 = vector.load %arg5[%c0_12, %c0_13] : memref<1x128xf32, #tpu.memory_space<vmem>>, vector<1x128xf32>
      %14 = vector.broadcast %13 : vector<1x128xf32> to vector<128x128xf32>
      %15 = arith.mulf %12, %14 : vector<128x128xf32>
      %c0_14 = arith.constant 0 : index
      %c0_15 = arith.constant 0 : index
      %16 = vector.load %arg6[%c0_14, %c0_15] : memref<1x128xf32, #tpu.memory_space<vmem>>, vector<1x128xf32>
      %17 = vector.broadcast %16 : vector<1x128xf32> to vector<128x128xf32>
      %18 = arith.addf %15, %17 : vector<128x128xf32>
      %cst_16 = arith.constant 0.000000e+00 : f32
      %19 = vector.broadcast %cst_16 : f32 to vector<128x128xf32>
      %20 = arith.maximumf %18, %19 : vector<128x128xf32>
      %21 = arith.truncf %20 : vector<128x128xf32> to vector<128x128xbf16>
      %c0_17 = arith.constant 0 : index
      %c0_18 = arith.constant 0 : index
      %22 = vector.load %arg7[%c0_17, %c0_18] : memref<128x128xbf16, #tpu.memory_space<vmem>>, vector<128x128xbf16>
      tpu.vector_store %arg7[%c0_17, %c0_18], %21 {strides = array<i32>} : memref<128x128xbf16, #tpu.memory_space<vmem>>, vector<128x128xbf16>,
    } else {
    }
    return
  }
  func.func @transform_0(%arg0: i32, %arg1: i32, %arg2: i32) -> (i32, i32) {
    %c0_i32 = arith.constant 0 : i32
    return %arg0, %arg2 : i32, i32
  }
  func.func @transform_1(%arg0: i32, %arg1: i32, %arg2: i32) -> (i32, i32) {
    %c0_i32 = arith.constant 0 : i32
    return %arg2, %arg1 : i32, i32
  }
  func.func @transform_2(%arg0: i32, %arg1: i32, %arg2: i32) -> (i32, i32) {
    %c0_i32 = arith.constant 0 : i32
    %c0_i32_0 = arith.constant 0 : i32
    return %c0_i32, %arg1 : i32, i32
  }
  func.func @transform_3(%arg0: i32, %arg1: i32, %arg2: i32) -> (i32, i32) {
    %c0_i32 = arith.constant 0 : i32
    %c0_i32_0 = arith.constant 0 : i32
    return %c0_i32, %arg1 : i32, i32
  }
  func.func @transform_4(%arg0: i32, %arg1: i32, %arg2: i32) -> (i32, i32) {
    %c0_i32 = arith.constant 0 : i32
    return %arg0, %arg1 : i32, i32
  }
}

</mosaic_0001>

<bundles_post_ra>
// kernel: tpu_custom_call.1
= control target key start
LH: loop header
LB: loop body
LE: loop exit
PB: predicated region body
PF: predicated region fallthrough
CT: control target
= control target key end

     0   :  { %9 = vsyncpa [#allocation4], 0  ;;  %s1618_s0 = inlined_call_operand.hbm [shape: bf16[512,128], index: 0, kind: input, shape index: {}]   ;;  %s1619_s1 = inlined_call_operand.hbm [shape: bf16[128,128], index: 1, kind: input, shape index: {}]   ;;  %s1620_s2 = inlined_call_operand.vmem [shape: f32[1,128], index: 2, kind: input, shape index: {}]   ;;  %s1621_s3 = inlined_call_operand.vmem [shape: f32[1,128], index: 3, kind: input, shape index: {}]   ;;  %s1622_s4 = inlined_call_operand.hbm [shape: bf16[512,128], index: 4, kind: output, shape index: {}]  }
   0x1   :  { %11 = vsyncpa [#allocation4 + $0x1], 0 }
   0x2   :  { %12 = vsyncpa [#allocation7], 0 }
   0x3   :  { %13 = vsyncpa [#allocation5], 0 }
   0x4   :  { %15 = vsyncpa [#allocation5 + $0x1], 0  ;;  %s1346_s15 = smov 0   ;;  %s1348_s16 = smov 0  }
   0x5   :  { %s1350_s17 = smov 0   ;;  %s1352_s18 = smov 0  }
   0x6   :  { %s1354_s19 = smov 0   ;;  %s1356_s20 = smov 0  }
   0x7 LB: > { %s893_s21 = sadd.s32 4294967295, %s1312_s20   ;;  %s894_s22 = sadd.s32 4294967294, %s1312_s20   ;;  %s1312_s20 = sphi %s1356_s20, %s21_s20   ;;  %s1308_s19 = sphi %s1354_s19, %s1645_s19   ;;  %s1304_s18 = sphi %s1352_s18, %s1644_s18   ;;  %s1300_s17 = sphi %s1350_s17, %s1643_s17   ;;  %s1296_s16 = sphi %s1348_s16, %s1642_s16   ;;  %s1292_s15 = sphi %s1346_s15, %s1641_s15  }
   0x8   : > { %p62_p0 = scmp.ne.s32.totalorder %s1296_s16, %s1292_s15  ;;  %p1380_p1 = scmp.eq.s32.totalorder %s893_s21, 0 }
   0x9   : > { %p1384_p2 = scmp.eq.s32.totalorder %s893_s21, 3  ;;  %p174_p3 = scmp.eq.s32.totalorder %s894_s22, 3 }
   0xa   : > { %s1627_s23 = scalar_select %p1380_p1, 1, 0 }
   0xb   : > { %s1628_s24 = scalar_select %p1384_p2, 1, 0 }
   0xc   : > { %p1390_p4 = por %p1380_p1, %p62_p0  ;;  %p895_p5 = scmp.ge.s32.totalorder %s1312_s20, 1 }
   0xd   : > { %p1395_p6 = por %p174_p3, %p62_p0  ;;  %p181_p7 = scmp.lt.s32.totalorder %s1312_s20, 5 }
   0xe   : > { %s1629_s25 = scalar_select %p1390_p4, 1, 0 }
   0xf   : > { %s1630_s26 = scalar_select %p1395_p6, 1, 0 }
  0x10   : > { %p1400_p8 = pnand %p895_p5, %p181_p7  ;;  %s1314_s28 = smov [#allocation6]  }
  0x11   : > { %s197_s29 = sshll.u32 %s1314_s28, 4  ;;  %s40_s5 = sadd.s32 1, %s1308_s19  ;;  %s198_s29 = int_to_ptr.vmem [resolvable:$true] %s197_s29 }
  0x12   : > { %s1631_s27 = scalar_select %p1400_p8, 1, 0 }
  0x13   : > { %p1083_p9 = pneg %p1400_p8  ;;  %s1168_s8 = scalar_lea.hbm %s1619_s1, 1024 }
  0x14   : > { %p1169_p11 = scmp.ne.s32.totalorder %s1619_s1, %s1168_s8  ;;  %p1175_p3 = scmp.lt.u32.totalorder %s1168_s8, %s1619_s1 }
  0x15   : > { %p1408_p10 = pnand %p1083_p9, %p1380_p1 }
  0x17   : > { %p1170_p12 = pneg %p1408_p10 }
  0x19   : > { %p1171_p13 = pnand %p1170_p12, %p1169_p11 }
  0x1b   : > { %p1172_p0 = pneg %p1171_p13 }
  0x1d   : > { %p1177_p5 = pnand %p1175_p3, %p1172_p0 }
  0x1f   : > { %1180 = shalt.err (!%p1177_p5)
}
  0x20   : > { %s1181_s13 = scalar_lea.vmem %s198_s29, 1024  ;;  %p1189_p1 = scmp.lt.s32.totalorder %s198_s29, %s198_s29 }
  0x21   : > { %p1182_p7 = scmp.ne.s32.totalorder %s198_s29, %s1181_s13  ;;  %p1190_p4 = scmp.lt.s32.totalorder %s1181_s13, %s1181_s13 }
  0x23   : > { %p1184_p9 = pnand %p1182_p7, %p1170_p12  ;;  %p1191_p8 = por %p1190_p4, %p1189_p1 }
  0x25   : > { %p1185_p6 = pneg %p1184_p9 }
  0x27   : > { %p1192_p2 = pnand %p1191_p8, %p1185_p6 }
  0x29   : > { %1195 = shalt.err (!%p1192_p2)
}
  0x2a   : > { %s1315_s14 = smov 64   ;;  %s1316_s21 = smov 4  }
  0x2b   : > { %1086 = dma.hbm_to_vmem [thread:$0]  (!%p1408_p10), %s1619_s1, 1024, %s198_s29, [#allocation7], %s1315_s14, %s1315_s14, %s1316_s21  }
  0x2c   : > { %p42_p1 = scmp.ge.s32.totalorder %s40_s5, 4  ;;  %s49_s6 = sadd.s32 1, %s1300_s17 }
  0x2d   : > { %p56_p2 = scmp.ne.s32.totalorder %s1300_s17, %s1296_s16  ;;  %p57_p4 = scmp.eq.s32.totalorder %s1312_s20, 0 }
  0x2e   : > { %s1647_s5 = smov (%p42_p1, %s40_s5), 0  ;;  %p1634_p8 = scmp.ne.s32.totalorder %s1628_s24, 0 }
  0x2f   : > { %p1438_p6 = por %p57_p4, %p56_p2  ;;  %s44_s8 = ssub.s32 %s1308_s19, %s1647_s5 }
  0x30   : > { %p1444_p11 = por %p1634_p8, %p56_p2  ;;  %p1096_p12 = scmp.lt.s32.totalorder %s1312_s20, 4 }
  0x31   : > { %p47_p10 = scmp.eq.s32.totalorder %s44_s8, 0  ;;  %s223_s29 = sand.u32 1, %s1300_s17  }
  0x32   : > { %s900_s9 = sshll.u32 %s223_s29, 6  ;;  %s946_s11 = sshll.u32 %s1308_s19, 10 }
  0x33   : > { %s1453_s10 = scalar_select %p47_p10, %s1300_s17, %s49_s6  }
  0x34   : > { %s1459_s22 = scalar_lea.hbm %s1618_s0, %s946_s11  ;;  %s227_s24 = scalar_lea.vmem [#allocation3], %s900_s9 }
  0x35   : > { %s235_s28 = sshll.u32 %s227_s24, 4  ;;  %p1465_p13 = pnand %p1096_p12, %p1438_p6  ;;  %s1461_s28 = int_to_ptr.vmem [resolvable:$true] %s235_s28 }
  0x36   : > { %s1469_s6 = scalar_lea.sflag [#allocation4], %s223_s29  ;;  %s1196_s12 = scalar_lea.hbm %s1459_s22, 1024 }
  0x37   : > { %p1197_p0 = scmp.ne.s32.totalorder %s1459_s22, %s1196_s12  ;;  %p1198_p3 = pneg %p1465_p13 }
  0x38   : > { %s1201_s7 = scalar_lea.hbm %s1618_s0, 4096  ;;  %p1202_p9 = scmp.lt.u32.totalorder %s1459_s22, %s1618_s0 }
  0x39   : > { %p1199_p5 = pnand %p1198_p3, %p1197_p0  ;;  %p1203_p1 = scmp.lt.u32.totalorder %s1201_s7, %s1196_s12 }
  0x3a   : > { %p1205_p4 = scmp.lt.u32.totalorder %s1196_s12, %s1459_s22 }
  0x3b   : > { %p1200_p7 = pneg %p1199_p5  ;;  %p1204_p2 = por %p1203_p1, %p1202_p9 }
  0x3d   : > { %p1206_p6 = por %p1205_p4, %p1204_p2 }
  0x3f   : > { %p1207_p8 = pnand %p1206_p6, %p1200_p7 }
  0x41   : > { %1210 = shalt.err (!%p1207_p8)
}
  0x42   : > { %s1211_s29 = scalar_lea.vmem %s1461_s28, 1024  ;;  %s1317_s9 = smov [#allocation3]  }
  0x43   : > { %p1212_p12 = scmp.ne.s32.totalorder %s1461_s28, %s1211_s29  ;;  %s1216_s11 = sshll.u32 %s1317_s9, 4  ;;  %s1217_s11 = int_to_ptr.vmem [resolvable:$false] %s1216_s11 }
  0x44   : > { %s1218_s13 = scalar_lea.vmem %s1217_s11, 2048  ;;  %p1219_p5 = scmp.lt.s32.totalorder %s1461_s28, %s1217_s11 }
  0x45   : > { %p1214_p10 = pnand %p1212_p12, %p1198_p3  ;;  %p1220_p9 = scmp.lt.s32.totalorder %s1218_s13, %s1211_s29 }
  0x47   : > { %p1215_p0 = pneg %p1214_p10  ;;  %p1221_p1 = por %p1220_p9, %p1219_p5 }
  0x49   : > { %p1222_p2 = pnand %p1221_p1, %p1215_p0 }
  0x4b   : > { %1225 = shalt.err (!%p1222_p2)
}
  0x4c   : > { %1090 = dma.hbm_to_vmem [thread:$0]  (!%p1465_p13), %s1459_s22, 1024, %s1461_s28, %s1469_s6, %s1315_s14, %s1315_s14, %s1316_s21  }
  0x4d   : > { %p1637_p3 = scmp.ne.s32.totalorder %s1631_s27, 0 }
  0x4e   : > { %s1503_s12 = sand.u32 (!%p1637_p3), 1, %s1296_s16   ;;  %p1638_p7 = scmp.ne.s32.totalorder (!%p1637_p3), %s1629_s25, 0 }
  0x4f   : > { %247 = sbr.rel (%p1637_p3) target bundleno = 370 (0x172), region = 36  ;;  %s904_s7 = sshll.u32 (!%p1637_p3), %s1503_s12, 6 }
  0x50   : > { %s250_s24 = scalar_lea.sflag (!%p1637_p3), [#allocation4], %s1503_s12  ;;  %s1509_s8 = scalar_lea.vmem (!%p1637_p3), [#allocation3], %s904_s7 }
  0x56   : > { %1279 = dma.done.wait (%p1638_p7), %s250_s24, 1024  }
  0x57   : > { %1281 = vsyncadd (%p1638_p7), %s250_s24, 4294966272  ;;  %p1639_p13 = scmp.ne.s32.totalorder %s1627_s23, 0 }
  0x59   : > { %1283 = dma.done.wait (%p1639_p13), [#allocation7], 1024  }
  0x5a   : > { %1285 = vsyncadd (%p1639_p13), [#allocation7], 4294966272  ;;  %v1152_v0 = vld [vmem:[#allocation6] sm:$0xff]   ;;  %v1153_v1 = vld [vmem:[#allocation6 + $0x8] sm:$0xff]   ;;  %s1545_s21 = scalar_lea.vmem [#allocation8], %s904_s7  ;;  %s963_s22 = sshll.u32 %s1304_s18, 10 }
  0x5b   : > { %1027 = vmatprep.subr.bf16.mxu0 %v1152_v0  ;;  %1059 = vmatprep.subr.bf16.mxu1 %v1152_v0  ;;  %v1154_v2 = vld [vmem:[#allocation6 + $0x10] sm:$0xff]   ;;  %v1155_v3 = vld [vmem:[#allocation6 + $0x18] sm:$0xff]   ;;  %v1160_v4 = vld [vmem:[%s1509_s8] sm:$0xff]   ;;  %s767_s28 = sshll.u32 %s1545_s21, 4  ;;  %s1564_s18 = scalar_lea.hbm %s1622_s4, %s963_s22  ;;  %s1566_s28 = int_to_ptr.vmem [resolvable:$true] %s767_s28 }
  0x5c   : > { %1028 = vmatpush3.bf16.msra.mxu0 %v1152_v0  ;;  %1067 = vmatpush3.bf16.msra.mxu1 %v1152_v0  ;;  %v1161_v5 = vld [vmem:[%s1509_s8 + $0x20] sm:$0xff]   ;;  %v1157_v7 = vld [vmem:[#allocation6 + $0x28] sm:$0xff]   ;;  %v1158_v8 = vld [vmem:[#allocation6 + $0x30] sm:$0xff]   ;;  %s753_s9 = scalar_lea.sflag [#allocation5], %s1503_s12  ;;  %s1226_s11 = scalar_lea.vmem %s1566_s28, 1024 }
  0x5d   : > { %1029 = vmatprep.subr.bf16.mxu0 %v1153_v1  ;;  %1060 = vmatprep.subr.bf16.mxu1 %v1153_v1  ;;  %v1156_v6 = vld [vmem:[#allocation6 + $0x20] sm:$0xff]   ;;  %v1159_v9 = vld [vmem:[#allocation6 + $0x38] sm:$0xff]   ;;  %v1162_v10 = vld [vmem:[%s1509_s8 + $0x8] sm:$0xff]   ;;  %p1227_p4 = scmp.ne.s32.totalorder %s1566_s28, %s1226_s11  ;;  %s1318_s13 = smov [#allocation8]  }
  0x5e   : > { %1043 = vmatprep.mubr.bf16.mxu0 %v1160_v4  ;;  %1051 = vmatprep.mubr.bf16.mxu1 %v1161_v5  ;;  %v1163_v11 = vld [vmem:[%s1509_s8 + $0x28] sm:$0xff]   ;;  %v1164_v12 = vld [vmem:[%s1509_s8 + $0x10] sm:$0xff]   ;;  %v1166_v14 = vld [vmem:[%s1509_s8 + $0x18] sm:$0xff]   ;;  %s1230_s7 = sshll.u32 %s1318_s13, 4  ;;  %s1231_s7 = int_to_ptr.vmem [resolvable:$false] %s1230_s7 }
  0x5f   : > { %v1165_v13 = vld [vmem:[%s1509_s8 + $0x30] sm:$0xff]   ;;  %v1167_v15 = vld [vmem:[%s1509_s8 + $0x38] sm:$0xff]   ;;  %v923_v16 = vld [vmem:[%s1620_s2] ss:$0 sm:$0xff]  ;;  %p1228_p6 = pnand %p1227_p4, %p1444_p11  ;;  %s1232_s24 = scalar_lea.vmem %s1231_s7, 2048 }
  0x60   : > { %1030 = vmatpush3.bf16.msra.mxu0 %v1153_v1  ;;  %1068 = vmatpush3.bf16.msra.mxu1 %v1153_v1  ;;  %v1533_v18 = vld [vmem:[%s1621_s3] ss:$0 sm:$0xff]  ;;  %p1233_p12 = scmp.lt.s32.totalorder %s1566_s28, %s1231_s7  ;;  %p1234_p10 = scmp.lt.s32.totalorder %s1232_s24, %s1226_s11 }
  0x61   : > { %1031 = vmatprep.subr.bf16.mxu0 %v1154_v2  ;;  %1061 = vmatprep.subr.bf16.mxu1 %v1154_v2  ;;  %p1229_p8 = pneg %p1228_p6 }
  0x62   : > { %p1235_p0 = por %p1234_p10, %p1233_p12 }
  0x64   : > { %1032 = vmatpush3.bf16.msra.mxu0 %v1154_v2  ;;  %1069 = vmatpush3.bf16.msra.mxu1 %v1154_v2  ;;  %p1236_p5 = pnand %p1235_p0, %p1229_p8 }
  0x65   : > { %1033 = vmatprep.subr.bf16.mxu0 %v1155_v3  ;;  %1062 = vmatprep.subr.bf16.mxu1 %v1155_v3 }
  0x68   : > { %1034 = vmatpush3.bf16.msra.mxu0 %v1155_v3  ;;  %1070 = vmatpush3.bf16.msra.mxu1 %v1155_v3 }
  0x69   : > { %1035 = vmatprep.subr.bf16.mxu0 %v1156_v6  ;;  %1063 = vmatprep.subr.bf16.mxu1 %v1156_v6 }
  0x6c   : > { %1036 = vmatpush3.bf16.msra.mxu0 %v1156_v6  ;;  %1071 = vmatpush3.bf16.msra.mxu1 %v1156_v6 }
  0x6d   : > { %1037 = vmatprep.subr.bf16.mxu0 %v1157_v7  ;;  %1064 = vmatprep.subr.bf16.mxu1 %v1157_v7 }
  0x70   : > { %1038 = vmatpush3.bf16.msra.mxu0 %v1157_v7  ;;  %1072 = vmatpush3.bf16.msra.mxu1 %v1157_v7 }
  0x71   : > { %1039 = vmatprep.subr.bf16.mxu0 %v1158_v8  ;;  %1065 = vmatprep.subr.bf16.mxu1 %v1158_v8 }
  0x74   : > { %1040 = vmatpush3.bf16.msra.mxu0 %v1158_v8  ;;  %1073 = vmatpush3.bf16.msra.mxu1 %v1158_v8 }
  0x75   : > { %1041 = vmatprep.subr.bf16.mxu0 %v1159_v9  ;;  %1066 = vmatprep.subr.bf16.mxu1 %v1159_v9 }
  0x78   : > { %1042 = vmatpush3.bf16.msra.mxu0 %v1159_v9  ;;  %1074 = vmatpush3.bf16.msra.mxu1 %v1159_v9 }
  0x7b   : > { %1044 = vmatmul.mubr.bf16.vlgmr.msra.gmra.mrb[0].mxu0 %v1162_v10  ;;  %1052 = vmatmul.mubr.bf16.vlgmr.msra.gmra.mrb[0].mxu1 %v1163_v11 }
  0x7c   : > { %1047 = vmatprep.mubr.bf16.mxu0 %v1164_v12  ;;  %1055 = vmatprep.mubr.bf16.mxu1 %v1165_v13 }
  0x83   : > { %1048 = vmatmul.mubr.bf16.gmra.mrb[4].mxu0 %v1166_v14  ;;  %1056 = vmatmul.mubr.bf16.gmra.mrb[4].mxu1 %v1167_v15 }
 0x14e   : > { %v1045_v17 = vpop.f32.mrb[0].mxu0  ;;  %v1053_v19 = vpop.f32.mrb[0].mxu1 }
 0x14f   : > { %v619_v20 = vmul.f32 %v1045_v17, %v923_v16  ;;  %v627_v21 = vmul.f32 %v1053_v19, %v923_v16  ;;  %v496_v22 = vpop.f32.mrb[1].mxu0  ;;  %v528_v23 = vpop.f32.mrb[1].mxu1 }
 0x150   : > { %v617_v24 = vmul.f32 %v923_v16, %v496_v22  ;;  %v625_v25 = vmul.f32 %v923_v16, %v528_v23  ;;  %v1046_v26 = vpop.f32.mrb[2].mxu0  ;;  %v1054_v27 = vpop.f32.mrb[2].mxu1 }
 0x151   : > { %v642_v28 = vadd.f32 %v1533_v18, %v619_v20  ;;  %v650_v29 = vadd.f32 %v1533_v18, %v627_v21  ;;  %v620_v30 = vmul.f32 %v1046_v26, %v923_v16  ;;  %v628_v31 = vmul.f32 %v1054_v27, %v923_v16  ;;  %v499_v32 = vpop.f32.mrb[3].mxu0  ;;  %v531_v33 = vpop.f32.mrb[3].mxu1 }
 0x152   : > { %v640_v34 = vadd.f32 %v1533_v18, %v617_v24  ;;  %v648_v35 = vadd.f32 %v1533_v18, %v625_v25  ;;  %v618_v36 = vmul.f32 %v923_v16, %v499_v32  ;;  %v626_v37 = vmul.f32 %v923_v16, %v531_v33 }
 0x153   : > { %v643_v38 = vadd.f32 %v1533_v18, %v620_v30  ;;  %v651_v39 = vadd.f32 %v1533_v18, %v628_v31  ;;  %v658_v42 = vmax.f32 %v642_v28, 0.0  ;;  %v666_v43 = vmax.f32 %v650_v29, 0.0 }
 0x154   : > { %v641_v40 = vadd.f32 %v1533_v18, %v618_v36  ;;  %v649_v41 = vadd.f32 %v1533_v18, %v626_v37  ;;  %v656_v46 = vmax.f32 %v640_v34, 0.0  ;;  %v664_v47 = vmax.f32 %v648_v35, 0.0 }
 0x155   : > { %v659_v44 = vmax.f32 %v643_v38, 0.0  ;;  %v667_v45 = vmax.f32 %v651_v39, 0.0 }
 0x156   : > { %v657_v48 = vmax.f32 %v641_v40, 0.0  ;;  %v665_v49 = vmax.f32 %v649_v41, 0.0  ;;  %v1049_v50 = vpop.f32.mrb[4].mxu0  ;;  %v1057_v51 = vpop.f32.mrb[4].mxu1 }
 0x157   : > { %v972_v52 = vpack.c.bf16 %v659_v44, %v658_v42  ;;  %v992_v53 = vpack.c.bf16 %v667_v45, %v666_v43  ;;  %v623_v54 = vmul.f32 %v1049_v50, %v923_v16  ;;  %v631_v55 = vmul.f32 %v1057_v51, %v923_v16  ;;  %v512_v56 = vpop.f32.mrb[5].mxu0  ;;  %v544_v57 = vpop.f32.mrb[5].mxu1 }
 0x158   : > { %v967_v58 = vpack.c.bf16 %v657_v48, %v656_v46  ;;  %v987_v59 = vpack.c.bf16 %v665_v49, %v664_v47  ;;  %v621_v60 = vmul.f32 %v923_v16, %v512_v56  ;;  %v629_v61 = vmul.f32 %v923_v16, %v544_v57  ;;  %v1050_v62 = vpop.f32.mrb[6].mxu0  ;;  %v1058_v63 = vpop.f32.mrb[6].mxu1 }
 0x159   : > { %1004 = vst [vmem:[%s1545_s21 + $0x8] sm:$0xff] %v972_v52   ;;  %1008 = vst [vmem:[%s1545_s21 + $0x28] sm:$0xff] %v992_v53   ;;  %v646_v0 = vadd.f32 %v1533_v18, %v623_v54  ;;  %v654_v1 = vadd.f32 %v1533_v18, %v631_v55  ;;  %v624_v2 = vmul.f32 %v1050_v62, %v923_v16  ;;  %v515_v4 = vpop.f32.mrb[7].mxu0  ;;  %v547_v5 = vpop.f32.mrb[7].mxu1 }
 0x15a   : > { %v632_v3 = vmul.f32 %v1058_v63, %v923_v16  ;;  %968 = vst [vmem:[%s1545_s21] sm:$0xff] %v967_v58   ;;  %1007 = vst [vmem:[%s1545_s21 + $0x20] sm:$0xff] %v987_v59   ;;  %v644_v6 = vadd.f32 %v1533_v18, %v621_v60  ;;  %v652_v7 = vadd.f32 %v1533_v18, %v629_v61 }
 0x15b   : > { %v622_v8 = vmul.f32 %v923_v16, %v515_v4  ;;  %v630_v9 = vmul.f32 %v923_v16, %v547_v5  ;;  %v647_v10 = vadd.f32 %v1533_v18, %v624_v2  ;;  %v662_v14 = vmax.f32 %v646_v0, 0.0 }
 0x15c   : > { %v655_v11 = vadd.f32 %v1533_v18, %v632_v3  ;;  %v670_v15 = vmax.f32 %v654_v1, 0.0  ;;  %v660_v16 = vmax.f32 %v644_v6, 0.0  ;;  %v668_v20 = vmax.f32 %v652_v7, 0.0 }
 0x15d   : > { %v645_v12 = vadd.f32 %v1533_v18, %v622_v8  ;;  %v653_v13 = vadd.f32 %v1533_v18, %v630_v9  ;;  %v663_v17 = vmax.f32 %v647_v10, 0.0 }
 0x15e   : > { %v671_v19 = vmax.f32 %v655_v11, 0.0 }
 0x15f   : > { %v661_v21 = vmax.f32 %v645_v12, 0.0  ;;  %v669_v22 = vmax.f32 %v653_v13, 0.0  ;;  %v982_v23 = vpack.c.bf16 %v663_v17, %v662_v14 }
 0x160   : > { %v1002_v24 = vpack.c.bf16 %v671_v19, %v670_v15 }
 0x161   : > { %v977_v18 = vpack.c.bf16 %v661_v21, %v660_v16  ;;  %v997_v25 = vpack.c.bf16 %v669_v22, %v668_v20  ;;  %1006 = vst [vmem:[%s1545_s21 + $0x18] sm:$0xff] %v982_v23  }
 0x162   : > { %1010 = vst [vmem:[%s1545_s21 + $0x38] sm:$0xff] %v1002_v24  }
 0x163   : > { %1005 = vst [vmem:[%s1545_s21 + $0x10] sm:$0xff] %v977_v18   ;;  %1009 = vst [vmem:[%s1545_s21 + $0x30] sm:$0xff] %v997_v25  }
 0x164   : > { %1239 = shalt.err (!%p1236_p5)
}
 0x165   : > { %s1240_s8 = scalar_lea.hbm %s1564_s18, 1024  ;;  %s1244_s27 = scalar_lea.hbm %s1622_s4, 4096 }
 0x166   : > { %p1241_p9 = scmp.ne.s32.totalorder %s1564_s18, %s1240_s8  ;;  %p1245_p3 = scmp.lt.u32.totalorder %s1564_s18, %s1622_s4 }
 0x167   : > { %p1246_p7 = scmp.lt.u32.totalorder %s1244_s27, %s1240_s8  ;;  %p1248_p4 = scmp.lt.u32.totalorder %s1240_s8, %s1564_s18 }
 0x168   : > { %p1242_p1 = pnand %p1241_p9, %p1444_p11 }
 0x169   : > { %p1247_p13 = por %p1246_p7, %p1245_p3 }
 0x16a   : > { %p1243_p2 = pneg %p1242_p1 }
 0x16b   : > { %p1249_p6 = por %p1248_p4, %p1247_p13 }
 0x16d   : > { %p1250_p8 = pnand %p1249_p6, %p1243_p2 }
 0x16f   : > { %1253 = shalt.err (!%p1250_p8)
}
 0x170   : > { %s1319_s22 = smov 64   ;;  %s1320_s6 = smov 4  }
 0x171   : > { %1081 = dma.vmem_to_hbm [thread:$0]  (%p1444_p11), %s1566_s28, 1024, %s1564_s18, %s753_s9, %s1319_s22, %s1319_s22, %s1320_s6  }
 0x172 PF: > { %p1098_p12 = scmp.ge.s32.totalorder %s1312_s20, 2  ;;  %s782_s29 = sand.u32 1, %s1292_s15  }
 0x173   : > { %p1640_p10 = scmp.ne.s32.totalorder %s1630_s26, 0  ;;  %s783_s11 = scalar_lea.sflag [#allocation5], %s782_s29 }
 0x175   : > { %p1092_p0 = pnand %p1098_p12, %p1640_p10 }
 0x177   : > { %1287 = dma.done.wait (!%p1092_p0), %s783_s11, 1024  }
 0x178   : > { %1289 = vsyncadd (!%p1092_p0), %s783_s11, 4294966272  ;;  %s21_s20 = sadd.s32 1, %s1312_s20   ;;  %s1641_s15 = smov %s1296_s16 }
 0x179   : > { %p18_p5 = scmp.ge.s32.totalorder %s21_s20, 6   ;;  %s1642_s16 = smov %s1300_s17 }
 0x17a   : > { %s1643_s17 = smov %s1453_s10  ;;  %s1644_s18 = smov %s1308_s19 }
 0x17b   : > { %s1645_s19 = smov %s1647_s5  ;;  %20 = sbr.rel (!%p18_p5) target bundleno = 7 (0x7), region = 100 }
 0x182   :  { %788 = vsyncpa [#allocation4], 1 }
 0x183   :  { %790 = vsyncpa [#allocation4 + $0x1], 1 }
 0x184   :  { %791 = vsyncpa [#allocation7], 1 }
 0x185   :  { %792 = vsyncpa [#allocation5], 1 }
 0x186   :  { %794 = vsyncpa [#allocation5 + $0x1], 1 }

</bundles_post_ra>
